<compile_context>
chip_gen: v5e
topology: v5e:2x2
jax: 0.10.0
libtpu: 0.0.40
codegen_flags: <defaults>
</compile_context>

<pallas_src>
import jax
import jax.numpy as jnp
from jax.experimental import pallas as pl
from jax.experimental.pallas import tpu as pltpu


def _lstm_kernel(x_ref, w_ih_t_ref, w_hh_t_ref, b_ref, w_lin_t_ref, b_lin_ref,
                 out_ref, gx_ref):
    L = x_ref.shape[0]          # static sequence length
    I = x_ref.shape[1]          # input size
    H = w_hh_t_ref.shape[0]     # hidden size

    # ---- input projection hoisted out of the recurrence: (L, 4H), computed once ----
    # Staged in VMEM scratch so each step's row comes from a vld, not a value slice.
    if I == 1:
        # (L,1) * (1,4H) broadcast multiply on the VPU -- no degenerate MXU matmul.
        gx_ref[...] = x_ref[...] * w_ih_t_ref[...] + b_ref[...]
    else:
        gx_ref[...] = (jnp.dot(x_ref[...], w_ih_t_ref[...],
                               preferred_element_type=jnp.float32) + b_ref[...])

    w_hh_t = w_hh_t_ref[...]    # (H, 4H), loaded once, reused every step

    # ---- recurrence: h, c live in vregs; fully unrolled static loop ----
    # TODO(synk): for very long sequences switch to lax.fori_loop (unroll=True over a
    #             small window) to bound trace/compile size; L=8 here so full unroll is best.
    h = jnp.zeros((1, H), jnp.float32)
    c = jnp.zeros((1, H), jnp.float32)
    for t in range(L):
        # TODO(synk): if a bundle dump shows this f32 dot decomposing into multiple bf16
        #             MXU passes, cast h / w_hh_t to bf16 (and consciously relax the
        #             reference tolerance) -- at 1x32x128 the MXU is pure fill/drain latency.
        gates = gx_ref[t:t + 1, :] + jnp.dot(h, w_hh_t,
                                             preferred_element_type=jnp.float32)
        # Single full-width EUP push. g-gate columns were pre-scaled by 2 on the host,
        # so tanh(z_g) = 2*sigmoid(2*z_g) - 1 is recovered from the same sigmoid pass.
        sg = jax.nn.sigmoid(gates)
        i_g = sg[:, 0 * H:1 * H]            # PyTorch gate order: i, f, g, o
        f_g = sg[:, 1 * H:2 * H]
        g_g = 2.0 * sg[:, 2 * H:3 * H] - 1.0
        o_g = sg[:, 3 * H:4 * H]
        c = f_g * c + i_g * g_g
        h = o_g * jnp.tanh(c)               # half-width EUP push

    # ---- linear head on the LAST hidden state (module returns predictions[-1]) ----
    out_ref[...] = (jnp.dot(h, w_lin_t_ref[...], preferred_element_type=jnp.float32)
                    + b_lin_ref[...])


def prepare_params(params):
    """One-time host-side prep: transposes, fused bias, g-gate pre-scale, casts."""
    w_ih, w_hh, b_ih, b_hh, w_lin, b_lin = params
    H = w_hh.shape[1]

    w_ih_t = jnp.asarray(w_ih.T, jnp.float32)             # (I, 4H)
    w_hh_t = jnp.asarray(w_hh.T, jnp.float32)              # (H, 4H)
    w_lin_t = jnp.asarray(w_lin.T, jnp.float32)            # (H, O)
    b = (b_ih + b_hh).reshape(1, 4 * H).astype(jnp.float32)
    b_lin2 = b_lin.reshape(1, -1).astype(jnp.float32)

    # Pre-scale g-gate (third quarter) columns by 2: tanh(x) = 2*sigmoid(2x) - 1,
    # so the kernel needs only one sigmoid pass over the full (1, 4H) gate vector.
    scale = jnp.ones((1, 4 * H), jnp.float32).at[:, 2 * H:3 * H].set(2.0)
    w_ih_t = w_ih_t * scale
    w_hh_t = w_hh_t * scale
    b = b * scale
    return (w_ih_t, w_hh_t, b, w_lin_t, b_lin2)


@jax.jit
def _forward_prepared(input_seq, w_ih_t, w_hh_t, b, w_lin_t, b_lin2):
    x = input_seq.astype(jnp.float32)
    L = x.shape[0]
    H4 = w_hh_t.shape[1]
    O = w_lin_t.shape[1]

    out = pl.pallas_call(
        _lstm_kernel,
        out_shape=jax.ShapeDtypeStruct((1, O), jnp.float32),
        in_specs=[pl.BlockSpec(memory_space=pltpu.MemorySpace.VMEM)] * 6,
        out_specs=pl.BlockSpec(memory_space=pltpu.MemorySpace.VMEM),
        scratch_shapes=[pltpu.VMEM((L, H4), jnp.float32)],   # staged gates_x
    )(x, w_ih_t, w_hh_t, b, w_lin_t, b_lin2)
    return out.reshape(-1)    # predictions[-1].view(-1)


def lstm_model_forward(input_seq, prepared_params):
    """input_seq: (seq_len, input_size). prepared_params from prepare_params()."""
    return _forward_prepared(input_seq, *prepared_params)


def init_params(key, input_size=1, hidden=32, output_size=1):
    # deterministic init, PyTorch-style U(-1/sqrt(H), 1/sqrt(H)), PyTorch weight layout
    ks = jax.random.split(key, 6)
    s = 1.0 / jnp.sqrt(hidden)
    w_ih = jax.random.uniform(ks[0], (4 * hidden, input_size), jnp.float32, -s, s)
    w_hh = jax.random.uniform(ks[1], (4 * hidden, hidden), jnp.float32, -s, s)
    b_ih = jax.random.uniform(ks[2], (4 * hidden,), jnp.float32, -s, s)
    b_hh = jax.random.uniform(ks[3], (4 * hidden,), jnp.float32, -s, s)
    w_lin = jax.random.uniform(ks[4], (output_size, hidden), jnp.float32, -s, s)
    b_lin = jax.random.uniform(ks[5], (output_size,), jnp.float32, -s, s)
    return (w_ih, w_hh, b_ih, b_hh, w_lin, b_lin)


def _reference(input_seq, params):
    # pure-JAX reference (standard tanh gate) for sanity checking
    w_ih, w_hh, b_ih, b_hh, w_lin, b_lin = params
    H = w_hh.shape[1]
    h = jnp.zeros((1, H), jnp.float32)
    c = jnp.zeros((1, H), jnp.float32)
    for t in range(input_seq.shape[0]):
        x_t = input_seq[t:t + 1, :]
        g = x_t @ w_ih.T + h @ w_hh.T + (b_ih + b_hh)[None, :]
        i = jax.nn.sigmoid(g[:, 0 * H:1 * H])
        f = jax.nn.sigmoid(g[:, 1 * H:2 * H])
        gg = jnp.tanh(g[:, 2 * H:3 * H])
        o = jax.nn.sigmoid(g[:, 3 * H:4 * H])
        c = f * c + i * gg
        h = o * jnp.tanh(c)
    return (h @ w_lin.T + b_lin[None, :]).reshape(-1)


if __name__ == "__main__":
    key = jax.random.PRNGKey(0)
    k_param, k_x = jax.random.split(key)

    seq_len, input_size, hidden, output_size = 8, 1, 32, 1
    params = init_params(k_param, input_size, hidden, output_size)
    x = jax.random.normal(k_x, (seq_len, input_size), jnp.float32)

    prepared = jax.block_until_ready(prepare_params(params))   # one-time prep

    y = lstm_model_forward(x, prepared)
    jax.block_until_ready(y)

    y_ref = _reference(x, params)
    assert y.shape == (output_size,)
    # tanh-via-sigmoid identity introduces only ulp-level differences vs. the reference;
    # 1e-4 is tight enough to catch any gate-order / layout bug.
    assert jnp.allclose(y, y_ref, atol=1e-4, rtol=1e-4)
    print("KERNEL_OK")
</pallas_src>

<mosaic_0001>
module attributes {stable_mosaic.version = 11 : i64} {
  func.func @_lstm_kernel(%arg0: memref<8x1xf32, #tpu.memory_space<vmem>>, %arg1: memref<1x128xf32, #tpu.memory_space<vmem>>, %arg2: memref<32x128xf32, #tpu.memory_space<vmem>>, %arg3: memref<1x128xf32, #tpu.memory_space<vmem>>, %arg4: memref<32x1xf32, #tpu.memory_space<vmem>>, %arg5: memref<1x1xf32, #tpu.memory_space<vmem>>, %arg6: memref<1x1xf32, #tpu.memory_space<vmem>>, %arg7: memref<8x128xf32, #tpu.memory_space<vmem>>) attributes {dimension_semantics = [], scalar_prefetch = 0 : i64, scratch_operands = 1 : i64, tpu.core_type = #tpu.core_type<tc>} {
    %c0 = arith.constant 0 : index
    %c0_0 = arith.constant 0 : index
    %0 = vector.load %arg0[%c0, %c0_0] : memref<8x1xf32, #tpu.memory_space<vmem>>, vector<8x1xf32>
    %c0_1 = arith.constant 0 : index
    %c0_2 = arith.constant 0 : index
    %1 = vector.load %arg1[%c0_1, %c0_2] : memref<1x128xf32, #tpu.memory_space<vmem>>, vector<1x128xf32>
    %2 = vector.broadcast %0 : vector<8x1xf32> to vector<8x128xf32>
    %3 = vector.broadcast %1 : vector<1x128xf32> to vector<8x128xf32>
    %4 = arith.mulf %2, %3 : vector<8x128xf32>
    %c0_3 = arith.constant 0 : index
    %c0_4 = arith.constant 0 : index
    %5 = vector.load %arg3[%c0_3, %c0_4] : memref<1x128xf32, #tpu.memory_space<vmem>>, vector<1x128xf32>
    %6 = vector.broadcast %5 : vector<1x128xf32> to vector<8x128xf32>
    %7 = arith.addf %4, %6 : vector<8x128xf32>
    %c0_5 = arith.constant 0 : index
    %c0_6 = arith.constant 0 : index
    %8 = vector.load %arg7[%c0_5, %c0_6] : memref<8x128xf32, #tpu.memory_space<vmem>>, vector<8x128xf32>
    tpu.vector_store %arg7[%c0_5, %c0_6], %7 {strides = array<i32>} : memref<8x128xf32, #tpu.memory_space<vmem>>, vector<8x128xf32>,
    %c0_7 = arith.constant 0 : index
    %c0_8 = arith.constant 0 : index
    %9 = vector.load %arg2[%c0_7, %c0_8] : memref<32x128xf32, #tpu.memory_space<vmem>>, vector<32x128xf32>
    %cst = arith.constant 0.000000e+00 : f32
    %10 = vector.broadcast %cst : f32 to vector<1x32xf32>
    %cst_9 = arith.constant 0.000000e+00 : f32
    %11 = vector.broadcast %cst_9 : f32 to vector<1x32xf32>
    %c0_10 = arith.constant 0 : index
    %c0_11 = arith.constant 0 : index
    %12 = vector.load %arg7[%c0_10, %c0_11] : memref<8x128xf32, #tpu.memory_space<vmem>>, vector<1x128xf32>
    %cst_12 = arith.constant dense<0.000000e+00> : vector<1x128xf32>
    %13 = tpu.matmul %10, %9, %cst_12 {dimension_numbers = #tpu.dot_dimension_numbers<[1], [0], [0], [1], [0, 0, 1, 1], [], []>} : vector<1x32xf32>, vector<32x128xf32>, vector<1x128xf32> -> vector<1x128xf32>
    %14 = arith.addf %12, %13 : vector<1x128xf32>
    %15 = arith.negf %14 : vector<1x128xf32>
    %16 = math.exp %15 : vector<1x128xf32>
    %cst_13 = arith.constant 1.000000e+00 : f32
    %17 = vector.broadcast %cst_13 : f32 to vector<1x128xf32>
    %18 = arith.addf %17, %16 : vector<1x128xf32>
    %19 = arith.divf %17, %18 : vector<1x128xf32>
    %20 = vector.extract_strided_slice %19 {offsets = [0, 0], sizes = [1, 32], strides = [1, 1]} : vector<1x128xf32> to vector<1x32xf32>
    %21 = vector.extract_strided_slice %19 {offsets = [0, 32], sizes = [1, 32], strides = [1, 1]} : vector<1x128xf32> to vector<1x32xf32>
    %22 = vector.extract_strided_slice %19 {offsets = [0, 64], sizes = [1, 32], strides = [1, 1]} : vector<1x128xf32> to vector<1x32xf32>
    %cst_14 = arith.constant 2.000000e+00 : f32
    %23 = vector.broadcast %cst_14 : f32 to vector<1x32xf32>
    %24 = arith.mulf %23, %22 : vector<1x32xf32>
    %cst_15 = arith.constant 1.000000e+00 : f32
    %25 = vector.broadcast %cst_15 : f32 to vector<1x32xf32>
    %26 = arith.subf %24, %25 : vector<1x32xf32>
    %27 = vector.extract_strided_slice %19 {offsets = [0, 96], sizes = [1, 32], strides = [1, 1]} : vector<1x128xf32> to vector<1x32xf32>
    %28 = arith.mulf %21, %11 : vector<1x32xf32>
    %29 = arith.mulf %20, %26 : vector<1x32xf32>
    %30 = arith.addf %28, %29 : vector<1x32xf32>
    %31 = math.tanh %30 : vector<1x32xf32>
    %32 = arith.mulf %27, %31 : vector<1x32xf32>
    %c1 = arith.constant 1 : index
    %c0_16 = arith.constant 0 : index
    %33 = vector.load %arg7[%c1, %c0_16] : memref<8x128xf32, #tpu.memory_space<vmem>>, vector<1x128xf32>
    %cst_17 = arith.constant dense<0.000000e+00> : vector<1x128xf32>
    %34 = tpu.matmul %32, %9, %cst_17 {dimension_numbers = #tpu.dot_dimension_numbers<[1], [0], [0], [1], [0, 0, 1, 1], [], []>} : vector<1x32xf32>, vector<32x128xf32>, vector<1x128xf32> -> vector<1x128xf32>
    %35 = arith.addf %33, %34 : vector<1x128xf32>
    %36 = arith.negf %35 : vector<1x128xf32>
    %37 = math.exp %36 : vector<1x128xf32>
    %cst_18 = arith.constant 1.000000e+00 : f32
    %38 = vector.broadcast %cst_18 : f32 to vector<1x128xf32>
    %39 = arith.addf %38, %37 : vector<1x128xf32>
    %40 = arith.divf %38, %39 : vector<1x128xf32>
    %41 = vector.extract_strided_slice %40 {offsets = [0, 0], sizes = [1, 32], strides = [1, 1]} : vector<1x128xf32> to vector<1x32xf32>
    %42 = vector.extract_strided_slice %40 {offsets = [0, 32], sizes = [1, 32], strides = [1, 1]} : vector<1x128xf32> to vector<1x32xf32>
    %43 = vector.extract_strided_slice %40 {offsets = [0, 64], sizes = [1, 32], strides = [1, 1]} : vector<1x128xf32> to vector<1x32xf32>
    %cst_19 = arith.constant 2.000000e+00 : f32
    %44 = vector.broadcast %cst_19 : f32 to vector<1x32xf32>
    %45 = arith.mulf %44, %43 : vector<1x32xf32>
    %cst_20 = arith.constant 1.000000e+00 : f32
    %46 = vector.broadcast %cst_20 : f32 to vector<1x32xf32>
    %47 = arith.subf %45, %46 : vector<1x32xf32>
    %48 = vector.extract_strided_slice %40 {offsets = [0, 96], sizes = [1, 32], strides = [1, 1]} : vector<1x128xf32> to vector<1x32xf32>
    %49 = arith.mulf %42, %30 : vector<1x32xf32>
    %50 = arith.mulf %41, %47 : vector<1x32xf32>
    %51 = arith.addf %49, %50 : vector<1x32xf32>
    %52 = math.tanh %51 : vector<1x32xf32>
    %53 = arith.mulf %48, %52 : vector<1x32xf32>
    %c2 = arith.constant 2 : index
    %c0_21 = arith.constant 0 : index
    %54 = vector.load %arg7[%c2, %c0_21] : memref<8x128xf32, #tpu.memory_space<vmem>>, vector<1x128xf32>
    %cst_22 = arith.constant dense<0.000000e+00> : vector<1x128xf32>
    %55 = tpu.matmul %53, %9, %cst_22 {dimension_numbers = #tpu.dot_dimension_numbers<[1], [0], [0], [1], [0, 0, 1, 1], [], []>} : vector<1x32xf32>, vector<32x128xf32>, vector<1x128xf32> -> vector<1x128xf32>
    %56 = arith.addf %54, %55 : vector<1x128xf32>
    %57 = arith.negf %56 : vector<1x128xf32>
    %58 = math.exp %57 : vector<1x128xf32>
    %cst_23 = arith.constant 1.000000e+00 : f32
    %59 = vector.broadcast %cst_23 : f32 to vector<1x128xf32>
    %60 = arith.addf %59, %58 : vector<1x128xf32>
    %61 = arith.divf %59, %60 : vector<1x128xf32>
    %62 = vector.extract_strided_slice %61 {offsets = [0, 0], sizes = [1, 32], strides = [1, 1]} : vector<1x128xf32> to vector<1x32xf32>
    %63 = vector.extract_strided_slice %61 {offsets = [0, 32], sizes = [1, 32], strides = [1, 1]} : vector<1x128xf32> to vector<1x32xf32>
    %64 = vector.extract_strided_slice %61 {offsets = [0, 64], sizes = [1, 32], strides = [1, 1]} : vector<1x128xf32> to vector<1x32xf32>
    %cst_24 = arith.constant 2.000000e+00 : f32
    %65 = vector.broadcast %cst_24 : f32 to vector<1x32xf32>
    %66 = arith.mulf %65, %64 : vector<1x32xf32>
    %cst_25 = arith.constant 1.000000e+00 : f32
    %67 = vector.broadcast %cst_25 : f32 to vector<1x32xf32>
    %68 = arith.subf %66, %67 : vector<1x32xf32>
    %69 = vector.extract_strided_slice %61 {offsets = [0, 96], sizes = [1, 32], strides = [1, 1]} : vector<1x128xf32> to vector<1x32xf32>
    %70 = arith.mulf %63, %51 : vector<1x32xf32>
    %71 = arith.mulf %62, %68 : vector<1x32xf32>
    %72 = arith.addf %70, %71 : vector<1x32xf32>
    %73 = math.tanh %72 : vector<1x32xf32>
    %74 = arith.mulf %69, %73 : vector<1x32xf32>
    %c3 = arith.constant 3 : index
    %c0_26 = arith.constant 0 : index
    %75 = vector.load %arg7[%c3, %c0_26] : memref<8x128xf32, #tpu.memory_space<vmem>>, vector<1x128xf32>
    %cst_27 = arith.constant dense<0.000000e+00> : vector<1x128xf32>
    %76 = tpu.matmul %74, %9, %cst_27 {dimension_numbers = #tpu.dot_dimension_numbers<[1], [0], [0], [1], [0, 0, 1, 1], [], []>} : vector<1x32xf32>, vector<32x128xf32>, vector<1x128xf32> -> vector<1x128xf32>
    %77 = arith.addf %75, %76 : vector<1x128xf32>
    %78 = arith.negf %77 : vector<1x128xf32>
    %79 = math.exp %78 : vector<1x128xf32>
    %cst_28 = arith.constant 1.000000e+00 : f32
    %80 = vector.broadcast %cst_28 : f32 to vector<1x128xf32>
    %81 = arith.addf %80, %79 : vector<1x128xf32>
    %82 = arith.divf %80, %81 : vector<1x128xf32>
    %83 = vector.extract_strided_slice %82 {offsets = [0, 0], sizes = [1, 32], strides = [1, 1]} : vector<1x128xf32> to vector<1x32xf32>
    %84 = vector.extract_strided_slice %82 {offsets = [0, 32], sizes = [1, 32], strides = [1, 1]} : vector<1x128xf32> to vector<1x32xf32>
    %85 = vector.extract_strided_slice %82 {offsets = [0, 64], sizes = [1, 32], strides = [1, 1]} : vector<1x128xf32> to vector<1x32xf32>
    %cst_29 = arith.constant 2.000000e+00 : f32
    %86 = vector.broadcast %cst_29 : f32 to vector<1x32xf32>
    %87 = arith.mulf %86, %85 : vector<1x32xf32>
    %cst_30 = arith.constant 1.000000e+00 : f32
    %88 = vector.broadcast %cst_30 : f32 to vector<1x32xf32>
    %89 = arith.subf %87, %88 : vector<1x32xf32>
    %90 = vector.extract_strided_slice %82 {offsets = [0, 96], sizes = [1, 32], strides = [1, 1]} : vector<1x128xf32> to vector<1x32xf32>
    %91 = arith.mulf %84, %72 : vector<1x32xf32>
    %92 = arith.mulf %83, %89 : vector<1x32xf32>
    %93 = arith.addf %91, %92 : vector<1x32xf32>
    %94 = math.tanh %93 : vector<1x32xf32>
    %95 = arith.mulf %90, %94 : vector<1x32xf32>
    %c4 = arith.constant 4 : index
    %c0_31 = arith.constant 0 : index
    %96 = vector.load %arg7[%c4, %c0_31] : memref<8x128xf32, #tpu.memory_space<vmem>>, vector<1x128xf32>
    %cst_32 = arith.constant dense<0.000000e+00> : vector<1x128xf32>
    %97 = tpu.matmul %95, %9, %cst_32 {dimension_numbers = #tpu.dot_dimension_numbers<[1], [0], [0], [1], [0, 0, 1, 1], [], []>} : vector<1x32xf32>, vector<32x128xf32>, vector<1x128xf32> -> vector<1x128xf32>
    %98 = arith.addf %96, %97 : vector<1x128xf32>
    %99 = arith.negf %98 : vector<1x128xf32>
    %100 = math.exp %99 : vector<1x128xf32>
    %cst_33 = arith.constant 1.000000e+00 : f32
    %101 = vector.broadcast %cst_33 : f32 to vector<1x128xf32>
    %102 = arith.addf %101, %100 : vector<1x128xf32>
    %103 = arith.divf %101, %102 : vector<1x128xf32>
    %104 = vector.extract_strided_slice %103 {offsets = [0, 0], sizes = [1, 32], strides = [1, 1]} : vector<1x128xf32> to vector<1x32xf32>
    %105 = vector.extract_strided_slice %103 {offsets = [0, 32], sizes = [1, 32], strides = [1, 1]} : vector<1x128xf32> to vector<1x32xf32>
    %106 = vector.extract_strided_slice %103 {offsets = [0, 64], sizes = [1, 32], strides = [1, 1]} : vector<1x128xf32> to vector<1x32xf32>
    %cst_34 = arith.constant 2.000000e+00 : f32
    %107 = vector.broadcast %cst_34 : f32 to vector<1x32xf32>
    %108 = arith.mulf %107, %106 : vector<1x32xf32>
    %cst_35 = arith.constant 1.000000e+00 : f32
    %109 = vector.broadcast %cst_35 : f32 to vector<1x32xf32>
    %110 = arith.subf %108, %109 : vector<1x32xf32>
    %111 = vector.extract_strided_slice %103 {offsets = [0, 96], sizes = [1, 32], strides = [1, 1]} : vector<1x128xf32> to vector<1x32xf32>
    %112 = arith.mulf %105, %93 : vector<1x32xf32>
    %113 = arith.mulf %104, %110 : vector<1x32xf32>
    %114 = arith.addf %112, %113 : vector<1x32xf32>
    %115 = math.tanh %114 : vector<1x32xf32>
    %116 = arith.mulf %111, %115 : vector<1x32xf32>
    %c5 = arith.constant 5 : index
    %c0_36 = arith.constant 0 : index
    %117 = vector.load %arg7[%c5, %c0_36] : memref<8x128xf32, #tpu.memory_space<vmem>>, vector<1x128xf32>
    %cst_37 = arith.constant dense<0.000000e+00> : vector<1x128xf32>
    %118 = tpu.matmul %116, %9, %cst_37 {dimension_numbers = #tpu.dot_dimension_numbers<[1], [0], [0], [1], [0, 0, 1, 1], [], []>} : vector<1x32xf32>, vector<32x128xf32>, vector<1x128xf32> -> vector<1x128xf32>
    %119 = arith.addf %117, %118 : vector<1x128xf32>
    %120 = arith.negf %119 : vector<1x128xf32>
    %121 = math.exp %120 : vector<1x128xf32>
    %cst_38 = arith.constant 1.000000e+00 : f32
    %122 = vector.broadcast %cst_38 : f32 to vector<1x128xf32>
    %123 = arith.addf %122, %121 : vector<1x128xf32>
    %124 = arith.divf %122, %123 : vector<1x128xf32>
    %125 = vector.extract_strided_slice %124 {offsets = [0, 0], sizes = [1, 32], strides = [1, 1]} : vector<1x128xf32> to vector<1x32xf32>
    %126 = vector.extract_strided_slice %124 {offsets = [0, 32], sizes = [1, 32], strides = [1, 1]} : vector<1x128xf32> to vector<1x32xf32>
    %127 = vector.extract_strided_slice %124 {offsets = [0, 64], sizes = [1, 32], strides = [1, 1]} : vector<1x128xf32> to vector<1x32xf32>
    %cst_39 = arith.constant 2.000000e+00 : f32
    %128 = vector.broadcast %cst_39 : f32 to vector<1x32xf32>
    %129 = arith.mulf %128, %127 : vector<1x32xf32>
    %cst_40 = arith.constant 1.000000e+00 : f32
    %130 = vector.broadcast %cst_40 : f32 to vector<1x32xf32>
    %131 = arith.subf %129, %130 : vector<1x32xf32>
    %132 = vector.extract_strided_slice %124 {offsets = [0, 96], sizes = [1, 32], strides = [1, 1]} : vector<1x128xf32> to vector<1x32xf32>
    %133 = arith.mulf %126, %114 : vector<1x32xf32>
    %134 = arith.mulf %125, %131 : vector<1x32xf32>
    %135 = arith.addf %133, %134 : vector<1x32xf32>
    %136 = math.tanh %135 : vector<1x32xf32>
    %137 = arith.mulf %132, %136 : vector<1x32xf32>
    %c6 = arith.constant 6 : index
    %c0_41 = arith.constant 0 : index
    %138 = vector.load %arg7[%c6, %c0_41] : memref<8x128xf32, #tpu.memory_space<vmem>>, vector<1x128xf32>
    %cst_42 = arith.constant dense<0.000000e+00> : vector<1x128xf32>
    %139 = tpu.matmul %137, %9, %cst_42 {dimension_numbers = #tpu.dot_dimension_numbers<[1], [0], [0], [1], [0, 0, 1, 1], [], []>} : vector<1x32xf32>, vector<32x128xf32>, vector<1x128xf32> -> vector<1x128xf32>
    %140 = arith.addf %138, %139 : vector<1x128xf32>
    %141 = arith.negf %140 : vector<1x128xf32>
    %142 = math.exp %141 : vector<1x128xf32>
    %cst_43 = arith.constant 1.000000e+00 : f32
    %143 = vector.broadcast %cst_43 : f32 to vector<1x128xf32>
    %144 = arith.addf %143, %142 : vector<1x128xf32>
    %145 = arith.divf %143, %144 : vector<1x128xf32>
    %146 = vector.extract_strided_slice %145 {offsets = [0, 0], sizes = [1, 32], strides = [1, 1]} : vector<1x128xf32> to vector<1x32xf32>
    %147 = vector.extract_strided_slice %145 {offsets = [0, 32], sizes = [1, 32], strides = [1, 1]} : vector<1x128xf32> to vector<1x32xf32>
    %148 = vector.extract_strided_slice %145 {offsets = [0, 64], sizes = [1, 32], strides = [1, 1]} : vector<1x128xf32> to vector<1x32xf32>
    %cst_44 = arith.constant 2.000000e+00 : f32
    %149 = vector.broadcast %cst_44 : f32 to vector<1x32xf32>
    %150 = arith.mulf %149, %148 : vector<1x32xf32>
    %cst_45 = arith.constant 1.000000e+00 : f32
    %151 = vector.broadcast %cst_45 : f32 to vector<1x32xf32>
    %152 = arith.subf %150, %151 : vector<1x32xf32>
    %153 = vector.extract_strided_slice %145 {offsets = [0, 96], sizes = [1, 32], strides = [1, 1]} : vector<1x128xf32> to vector<1x32xf32>
    %154 = arith.mulf %147, %135 : vector<1x32xf32>
    %155 = arith.mulf %146, %152 : vector<1x32xf32>
    %156 = arith.addf %154, %155 : vector<1x32xf32>
    %157 = math.tanh %156 : vector<1x32xf32>
    %158 = arith.mulf %153, %157 : vector<1x32xf32>
    %c7 = arith.constant 7 : index
    %c0_46 = arith.constant 0 : index
    %159 = vector.load %arg7[%c7, %c0_46] : memref<8x128xf32, #tpu.memory_space<vmem>>, vector<1x128xf32>
    %cst_47 = arith.constant dense<0.000000e+00> : vector<1x128xf32>
    %160 = tpu.matmul %158, %9, %cst_47 {dimension_numbers = #tpu.dot_dimension_numbers<[1], [0], [0], [1], [0, 0, 1, 1], [], []>} : vector<1x32xf32>, vector<32x128xf32>, vector<1x128xf32> -> vector<1x128xf32>
    %161 = arith.addf %159, %160 : vector<1x128xf32>
    %162 = arith.negf %161 : vector<1x128xf32>
    %163 = math.exp %162 : vector<1x128xf32>
    %cst_48 = arith.constant 1.000000e+00 : f32
    %164 = vector.broadcast %cst_48 : f32 to vector<1x128xf32>
    %165 = arith.addf %164, %163 : vector<1x128xf32>
    %166 = arith.divf %164, %165 : vector<1x128xf32>
    %167 = vector.extract_strided_slice %166 {offsets = [0, 0], sizes = [1, 32], strides = [1, 1]} : vector<1x128xf32> to vector<1x32xf32>
    %168 = vector.extract_strided_slice %166 {offsets = [0, 32], sizes = [1, 32], strides = [1, 1]} : vector<1x128xf32> to vector<1x32xf32>
    %169 = vector.extract_strided_slice %166 {offsets = [0, 64], sizes = [1, 32], strides = [1, 1]} : vector<1x128xf32> to vector<1x32xf32>
    %cst_49 = arith.constant 2.000000e+00 : f32
    %170 = vector.broadcast %cst_49 : f32 to vector<1x32xf32>
    %171 = arith.mulf %170, %169 : vector<1x32xf32>
    %cst_50 = arith.constant 1.000000e+00 : f32
    %172 = vector.broadcast %cst_50 : f32 to vector<1x32xf32>
    %173 = arith.subf %171, %172 : vector<1x32xf32>
    %174 = vector.extract_strided_slice %166 {offsets = [0, 96], sizes = [1, 32], strides = [1, 1]} : vector<1x128xf32> to vector<1x32xf32>
    %175 = arith.mulf %168, %156 : vector<1x32xf32>
    %176 = arith.mulf %167, %173 : vector<1x32xf32>
    %177 = arith.addf %175, %176 : vector<1x32xf32>
    %178 = math.tanh %177 : vector<1x32xf32>
    %179 = arith.mulf %174, %178 : vector<1x32xf32>
    %c0_51 = arith.constant 0 : index
    %c0_52 = arith.constant 0 : index
    %180 = vector.load %arg4[%c0_51, %c0_52] : memref<32x1xf32, #tpu.memory_space<vmem>>, vector<32x1xf32>
    %cst_53 = arith.constant dense<0.000000e+00> : vector<1x1xf32>
    %181 = tpu.matmul %179, %180, %cst_53 {dimension_numbers = #tpu.dot_dimension_numbers<[1], [0], [0], [1], [0, 0, 1, 1], [], []>} : vector<1x32xf32>, vector<32x1xf32>, vector<1x1xf32> -> vector<1x1xf32>
    %c0_54 = arith.constant 0 : index
    %c0_55 = arith.constant 0 : index
    %182 = vector.load %arg5[%c0_54, %c0_55] : memref<1x1xf32, #tpu.memory_space<vmem>>, vector<1x1xf32>
    %183 = arith.addf %181, %182 : vector<1x1xf32>
    %c0_56 = arith.constant 0 : index
    %c0_57 = arith.constant 0 : index
    %184 = vector.load %arg6[%c0_56, %c0_57] : memref<1x1xf32, #tpu.memory_space<vmem>>, vector<1x1xf32>
    tpu.vector_store %arg6[%c0_56, %c0_57], %183 {strides = array<i32>} : memref<1x1xf32, #tpu.memory_space<vmem>>, vector<1x1xf32>,
    return
  }
}

</mosaic_0001>

<bundles_post_ra>
// kernel: _forward_prepared.1
= control target key start
LH: loop header
LB: loop body
LE: loop exit
PB: predicated region body
PF: predicated region fallthrough
CT: control target
= control target key end

     0   :  { %s839_s0 = inlined_call_operand.vmem [shape: f32[8,1], index: 0, kind: input, shape index: {}]   ;;  %s840_s1 = inlined_call_operand.vmem [shape: f32[1,128], index: 1, kind: input, shape index: {}]   ;;  %s841_s2 = inlined_call_operand.vmem [shape: f32[32,128], index: 2, kind: input, shape index: {}]   ;;  %s842_s3 = inlined_call_operand.vmem [shape: f32[1,128], index: 3, kind: input, shape index: {}]   ;;  %s843_s4 = inlined_call_operand.vmem [shape: f32[32,1], index: 4, kind: input, shape index: {}]   ;;  %s844_s5 = inlined_call_operand.<no memory space> [shape: f32[1,1], index: 5, kind: input, shape index: {}]   ;;  %s845_s6 = inlined_call_operand.hbm [shape: f32[1,1], index: 6, kind: output, shape index: {}]  }
   0x1   :  { %v11_v0 = vstv %s844_s5 }
   0x2   :  { %12 = vst [vmem:[#allocation3] sm:$0x1] %v11_v0 }
   0x3   :  { %v46_v1 = vld [vmem:[%s841_s2 + $0x18] sm:$0xff]  ;;  %v45_v2 = vld [vmem:[%s841_s2 + $0x10] sm:$0xff]  ;;  %v720_v3 = vmov 0   ;;  %v26_v4 = vld [vmem:[%s839_s0] sm:$0xff] }
   0x4   :  { %64 = vmatpush.msra.mxu0 %v46_v1  ;;  %643 = vset.pattern.permute.xlu0 %v720_v3  ;;  %v44_v5 = vld [vmem:[%s841_s2 + $0x8] sm:$0xff] }
   0x5   :  { %30 = vperm.xlu0 %643, %v26_v4   ;;  %129 = vmatpush.msra.mxu1 %v46_v1 }
   0x6   :  { %65 = vmatpush.msra.mxu0 %v45_v2  ;;  %194 = vmatpush.msra.mxu2 %v46_v1 }
   0x7   :  { %13 = vsyncpa [#allocation5], 0  ;;  %v43_v6 = vld [vmem:[%s841_s2] sm:$0xff]  ;;  %130 = vmatpush.msra.mxu1 %v45_v2  ;;  %259 = vmatpush.msra.mxu3 %v46_v1  ;;  %v721_v7 = vmov 0.0   ;;  %vm48_vm4 = vcmask 261120   ;;  %s724_s18 = smov [#allocation4]  }
   0x8   :  { %66 = vmatpush.msra.mxu0 %v44_v5  ;;  %195 = vmatpush.msra.mxu2 %v45_v2  ;;  %v644_v8 = vld [vmem:[%s840_s1] ss:$0 sm:$0xff]  ;;  %s722_s1 = smov 64   ;;  %s603_s19 = sshll.u32 %s724_s18, 4  ;;  %s604_s19 = int_to_ptr.vmem [resolvable:$true] %s603_s19 }
   0x9   :  { %131 = vmatpush.msra.mxu1 %v44_v5  ;;  %260 = vmatpush.msra.mxu3 %v45_v2  ;;  %v645_v9 = vld [vmem:[%s842_s3] ss:$0 sm:$0xff]  ;;  %s723_s3 = smov 32   ;;  %s605_s22 = sshll.u32 %s845_s6, 4  ;;  %s606_s22 = int_to_ptr.hbm [resolvable:$true] %s605_s22 }
   0xa   :  { %67 = vmatpush.msra.mxu0 %v43_v6  ;;  %196 = vmatpush.msra.mxu2 %v44_v5 }
   0xb   :  { %68 = vmatmul.f32.vlgmr.msra.gmra.mxu0 %v721_v7  ;;  %132 = vmatpush.msra.mxu1 %v43_v6 }
   0xc   :  { %197 = vmatpush.msra.mxu2 %v43_v6  ;;  %261 = vmatpush.msra.mxu3 %v44_v5 }
   0xd   :  { %324 = vmatpush.msrb.mxu0 %v46_v1  ;;  %389 = vmatpush.msrb.mxu1 %v46_v1 }
   0xe   :  { %262 = vmatpush.msra.mxu3 %v43_v6  ;;  %454 = vmatpush.msrb.mxu2 %v46_v1 }
   0xf   :  { %325 = vmatpush.msrb.mxu0 %v45_v2  ;;  %390 = vmatpush.msrb.mxu1 %v45_v2 }
  0x10   :  { %455 = vmatpush.msrb.mxu2 %v45_v2  ;;  %519 = vmatpush.msrb.mxu3 %v46_v1 }
  0x11   :  { %326 = vmatpush.msrb.mxu0 %v44_v5  ;;  %391 = vmatpush.msrb.mxu1 %v44_v5 }
  0x12   :  { %456 = vmatpush.msrb.mxu2 %v44_v5  ;;  %520 = vmatpush.msrb.mxu3 %v45_v2 }
  0x13   :  { %327 = vmatpush.msrb.mxu0 %v43_v6  ;;  %392 = vmatpush.msrb.mxu1 %v43_v6 }
  0x14   :  { %457 = vmatpush.msrb.mxu2 %v43_v6  ;;  %521 = vmatpush.msrb.mxu3 %v44_v5 }
  0x16   :  { %522 = vmatpush.msrb.mxu3 %v43_v6 }
  0x77   :  { %v31_v10 = vpop.permute.xlu0 %30 }
  0x78   :  { %v36_v11 = vmul.f32 %v644_v8, %v31_v10 }
  0x7a   :  { %v41_v12 = vadd.f32 %v645_v9, %v36_v11 }
  0x7c   :  { %42 = vst [vmem:[#allocation2] sm:$0xff] %v41_v12 }
  0x83   :  { %v47_v13 = vld [vmem:[#allocation2] sm:$0x1]  ;;  %v111_v40 = vld [vmem:[#allocation2 + $0x1] sm:$0x1]  ;;  %v176_v3 = vld [vmem:[#allocation2 + $0x2] sm:$0x1] }
  0x88   :  { %v69_v14 = vpop.f32.mrf.mxu0 }
  0x89   :  { %v72_v15 = vadd.f32 %v69_v14, %v47_v13 }
  0x8b   :  { %v614_v16 = vmul.f32 -1.442695, %v72_v15 }
  0x8d   :  { %646 = vpow2.f32 %v614_v16 }
  0x93   :  { %v647_v17 = vpop.eup %646 }
  0x94   :  { %v76_v18 = vadd.f32 1.0, %v647_v17 }
  0x96   :  { %648 = vrcp.f32 %v76_v18  ;;  %v88_v22 = vand.u32 2147483648, %v76_v18  ;;  %v86_v24 = vand.u32 2147483647, %v76_v18  ;;  %vm82_vm1 = vweird.f32 %v76_v18 }
  0x98   :  { %v89_v26 = vor.u32 1.1754944e-38, %v88_v22  ;;  %vm87_vm3 = vcmp.eq.f32.partialorder %v86_v24, 8.507059e+37 }
  0x9c   :  { %v649_v19 = vpop.eup %648 }
  0x9d   :  { %v78_v20 = vmul.f32 %v649_v19, %v76_v18  ;;  %vm83_vm0 = vweird.f32 %v649_v19 }
  0x9e   :  { %vm84_vm2 = vmor %vm82_vm1, %vm83_vm0 }
  0x9f   :  { %v79_v21 = vsub.f32 1.0, %v78_v20 }
  0xa1   :  { %v80_v23 = vmul.f32 %v649_v19, %v79_v21 }
  0xa3   :  { %v81_v25 = vadd.f32 %v649_v19, %v80_v23 }
  0xa5   :  { %v85_v27 = vsel %vm84_vm2, %v649_v19, %v81_v25 }
  0xa6   :  { %v90_v28 = vsel %vm87_vm3, %v89_v26, %v85_v27 }
  0xa7   :  { %v92_v29 = vmul.f32 2.0, %v90_v28  ;;  %v94_v33 = vmul.f32 0.0, %v90_v28 }
  0xa9   :  { %v615_v30 = vadd.f32 -1.0, %v92_v29 }
  0xab   :  { %96 = vrot.lane.b32.xlu0 %v615_v30, %s722_s1  ;;  %v241_v30 = vld [vmem:[#allocation2 + $0x3] sm:$0x1] }
 0x11d   :  { %v97_v31 = vpop.permute.xlu0 %96 }
 0x11e   :  { %v99_v32 = vmul.f32 %v97_v31, %v90_v28 }
 0x120   :  { %101 = vrot.lane.b32.xlu1 %v99_v32, %s723_s3 }
 0x192   :  { %v102_v34 = vpop.permute.xlu1 %101 }
 0x193   :  { %v104_v35 = vadd.f32 %v102_v34, %v94_v33 }
 0x195   :  { %650 = vtanh.f32 %v104_v35 }
 0x19b   :  { %v651_v36 = vpop.eup %650 }
 0x19c   :  { %107 = vrot.lane.b32.xlu1 %v651_v36, %s722_s1 }
 0x20e   :  { %v108_v37 = vpop.permute.xlu1 %107 }
 0x20f   :  { %v110_v38 = vmul.f32 %v108_v37, %v90_v28 }
 0x211   :  { %113 = vrot.lane.b32.xlu2 %v110_v38, %s723_s3 }
 0x26b   :  { %v114_v39 = vpop.permute.xlu2 %113 }
 0x26c   :  { %616 = vmatmul.msk.f32.vlgmr.msra.gmra.mxu1 %vm48_vm4, %v114_v39 }
 0x2e9   :  { %v134_v41 = vpop.f32.mrf.mxu1 }
 0x2ea   :  { %v137_v42 = vadd.f32 %v134_v41, %v111_v40 }
 0x2ec   :  { %v617_v43 = vmul.f32 -1.442695, %v137_v42 }
 0x2ee   :  { %652 = vpow2.f32 %v617_v43 }
 0x2f4   :  { %v653_v44 = vpop.eup %652 }
 0x2f5   :  { %v141_v45 = vadd.f32 1.0, %v653_v44 }
 0x2f7   :  { %654 = vrcp.f32 %v141_v45  ;;  %v153_v49 = vand.u32 2147483648, %v141_v45  ;;  %v151_v51 = vand.u32 2147483647, %v141_v45  ;;  %vm147_vm6 = vweird.f32 %v141_v45 }
 0x2f9   :  { %v154_v53 = vor.u32 1.1754944e-38, %v153_v49  ;;  %vm152_vm8 = vcmp.eq.f32.partialorder %v151_v51, 8.507059e+37 }
 0x2fd   :  { %v655_v46 = vpop.eup %654 }
 0x2fe   :  { %v143_v47 = vmul.f32 %v655_v46, %v141_v45  ;;  %vm148_vm5 = vweird.f32 %v655_v46 }
 0x2ff   :  { %vm149_vm7 = vmor %vm147_vm6, %vm148_vm5 }
 0x300   :  { %v144_v48 = vsub.f32 1.0, %v143_v47 }
 0x302   :  { %v145_v50 = vmul.f32 %v655_v46, %v144_v48 }
 0x304   :  { %v146_v52 = vadd.f32 %v655_v46, %v145_v50 }
 0x306   :  { %v150_v54 = vsel %vm149_vm7, %v655_v46, %v146_v52 }
 0x307   :  { %v155_v55 = vsel %vm152_vm8, %v154_v53, %v150_v54 }
 0x308   :  { %v157_v56 = vmul.f32 2.0, %v155_v55  ;;  %v159_v60 = vmul.f32 %v155_v55, %v104_v35 }
 0x30a   :  { %v618_v57 = vadd.f32 -1.0, %v157_v56 }
 0x30c   :  { %161 = vrot.lane.b32.xlu2 %v618_v57, %s722_s1  ;;  %v306_v57 = vld [vmem:[#allocation2 + $0x4] sm:$0x1] }
 0x366   :  { %v162_v58 = vpop.permute.xlu2 %161 }
 0x367   :  { %v164_v59 = vmul.f32 %v162_v58, %v155_v55 }
 0x369   :  { %166 = vrot.lane.b32.xlu0 %v164_v59, %s723_s3 }
 0x3db   :  { %v167_v61 = vpop.permute.xlu0 %166 }
 0x3dc   :  { %v169_v62 = vadd.f32 %v167_v61, %v159_v60 }
 0x3de   :  { %656 = vtanh.f32 %v169_v62 }
 0x3e4   :  { %v657_v63 = vpop.eup %656 }
 0x3e5   :  { %172 = vrot.lane.b32.xlu1 %v657_v63, %s722_s1 }
 0x457   :  { %v173_v0 = vpop.permute.xlu1 %172 }
 0x458   :  { %v175_v1 = vmul.f32 %v173_v0, %v155_v55 }
 0x45a   :  { %178 = vrot.lane.b32.xlu2 %v175_v1, %s723_s3 }
 0x4b4   :  { %v179_v2 = vpop.permute.xlu2 %178 }
 0x4b5   :  { %619 = vmatmul.msk.f32.vlgmr.msra.gmra.mxu2 %vm48_vm4, %v179_v2 }
 0x538   :  { %v199_v4 = vpop.f32.mrf.mxu2 }
 0x539   :  { %v202_v5 = vadd.f32 %v199_v4, %v176_v3 }
 0x53b   :  { %v620_v6 = vmul.f32 -1.442695, %v202_v5 }
 0x53d   :  { %658 = vpow2.f32 %v620_v6 }
 0x543   :  { %v659_v7 = vpop.eup %658 }
 0x544   :  { %v206_v8 = vadd.f32 1.0, %v659_v7 }
 0x546   :  { %660 = vrcp.f32 %v206_v8  ;;  %v218_v12 = vand.u32 2147483648, %v206_v8  ;;  %v216_v14 = vand.u32 2147483647, %v206_v8  ;;  %vm212_vm10 = vweird.f32 %v206_v8 }
 0x548   :  { %v219_v16 = vor.u32 1.1754944e-38, %v218_v12  ;;  %vm217_vm12 = vcmp.eq.f32.partialorder %v216_v14, 8.507059e+37 }
 0x54c   :  { %v661_v9 = vpop.eup %660 }
 0x54d   :  { %v208_v10 = vmul.f32 %v661_v9, %v206_v8  ;;  %vm213_vm9 = vweird.f32 %v661_v9 }
 0x54e   :  { %vm214_vm11 = vmor %vm212_vm10, %vm213_vm9 }
 0x54f   :  { %v209_v11 = vsub.f32 1.0, %v208_v10 }
 0x551   :  { %v210_v13 = vmul.f32 %v661_v9, %v209_v11 }
 0x553   :  { %v211_v15 = vadd.f32 %v661_v9, %v210_v13 }
 0x555   :  { %v215_v17 = vsel %vm214_vm11, %v661_v9, %v211_v15 }
 0x556   :  { %v220_v18 = vsel %vm217_vm12, %v219_v16, %v215_v17 }
 0x557   :  { %v222_v19 = vmul.f32 2.0, %v220_v18  ;;  %v224_v23 = vmul.f32 %v220_v18, %v169_v62 }
 0x559   :  { %v621_v20 = vadd.f32 -1.0, %v222_v19 }
 0x55b   :  { %226 = vrot.lane.b32.xlu0 %v621_v20, %s722_s1  ;;  %v371_v20 = vld [vmem:[#allocation2 + $0x5] sm:$0x1] }
 0x5cd   :  { %v227_v21 = vpop.permute.xlu0 %226 }
 0x5ce   :  { %v229_v22 = vmul.f32 %v227_v21, %v220_v18 }
 0x5d0   :  { %231 = vrot.lane.b32.xlu1 %v229_v22, %s723_s3 }
 0x642   :  { %v232_v24 = vpop.permute.xlu1 %231 }
 0x643   :  { %v234_v25 = vadd.f32 %v232_v24, %v224_v23 }
 0x645   :  { %662 = vtanh.f32 %v234_v25 }
 0x64b   :  { %v663_v26 = vpop.eup %662 }
 0x64c   :  { %237 = vrot.lane.b32.xlu2 %v663_v26, %s722_s1 }
 0x6a6   :  { %v238_v27 = vpop.permute.xlu2 %237 }
 0x6a7   :  { %v240_v28 = vmul.f32 %v238_v27, %v220_v18 }
 0x6a9   :  { %243 = vrot.lane.b32.xlu0 %v240_v28, %s723_s3 }
 0x71b   :  { %v244_v29 = vpop.permute.xlu0 %243 }
 0x71c   :  { %622 = vmatmul.msk.f32.vlgmr.msra.gmra.mxu3 %vm48_vm4, %v244_v29 }
 0x79f   :  { %v264_v31 = vpop.f32.mrf.mxu3 }
 0x7a0   :  { %v267_v32 = vadd.f32 %v264_v31, %v241_v30 }
 0x7a2   :  { %v623_v33 = vmul.f32 -1.442695, %v267_v32 }
 0x7a4   :  { %664 = vpow2.f32 %v623_v33 }
 0x7aa   :  { %v665_v34 = vpop.eup %664 }
 0x7ab   :  { %v271_v35 = vadd.f32 1.0, %v665_v34 }
 0x7ad   :  { %666 = vrcp.f32 %v271_v35  ;;  %v283_v39 = vand.u32 2147483648, %v271_v35  ;;  %v281_v41 = vand.u32 2147483647, %v271_v35  ;;  %vm277_vm14 = vweird.f32 %v271_v35 }
 0x7af   :  { %v284_v43 = vor.u32 1.1754944e-38, %v283_v39  ;;  %vm282_vm0 = vcmp.eq.f32.partialorder %v281_v41, 8.507059e+37 }
 0x7b3   :  { %v667_v36 = vpop.eup %666 }
 0x7b4   :  { %v273_v37 = vmul.f32 %v667_v36, %v271_v35  ;;  %vm278_vm13 = vweird.f32 %v667_v36 }
 0x7b5   :  { %vm279_vm15 = vmor %vm277_vm14, %vm278_vm13 }
 0x7b6   :  { %v274_v38 = vsub.f32 1.0, %v273_v37 }
 0x7b8   :  { %v275_v40 = vmul.f32 %v667_v36, %v274_v38 }
 0x7ba   :  { %v276_v42 = vadd.f32 %v667_v36, %v275_v40 }
 0x7bc   :  { %v280_v44 = vsel %vm279_vm15, %v667_v36, %v276_v42 }
 0x7bd   :  { %v285_v45 = vsel %vm282_vm0, %v284_v43, %v280_v44 }
 0x7be   :  { %v287_v46 = vmul.f32 2.0, %v285_v45  ;;  %v289_v50 = vmul.f32 %v285_v45, %v234_v25 }
 0x7c0   :  { %v624_v47 = vadd.f32 -1.0, %v287_v46 }
 0x7c2   :  { %291 = vrot.lane.b32.xlu1 %v624_v47, %s722_s1  ;;  %v436_v47 = vld [vmem:[#allocation2 + $0x6] sm:$0x1] }
 0x834   :  { %v292_v48 = vpop.permute.xlu1 %291 }
 0x835   :  { %v294_v49 = vmul.f32 %v292_v48, %v285_v45 }
 0x837   :  { %296 = vrot.lane.b32.xlu2 %v294_v49, %s723_s3 }
 0x891   :  { %v297_v51 = vpop.permute.xlu2 %296 }
 0x892   :  { %v299_v52 = vadd.f32 %v297_v51, %v289_v50 }
 0x894   :  { %668 = vtanh.f32 %v299_v52 }
 0x89a   :  { %v669_v53 = vpop.eup %668 }
 0x89b   :  { %302 = vrot.lane.b32.xlu0 %v669_v53, %s722_s1 }
 0x90d   :  { %v303_v54 = vpop.permute.xlu0 %302 }
 0x90e   :  { %v305_v55 = vmul.f32 %v303_v54, %v285_v45 }
 0x910   :  { %308 = vrot.lane.b32.xlu1 %v305_v55, %s723_s3 }
 0x982   :  { %v309_v56 = vpop.permute.xlu1 %308 }
 0x983   :  { %625 = vmatmul.msk.f32.vlgmr.msrb.gmra.mxu0 %vm48_vm4, %v309_v56 }
 0xa00   :  { %v329_v58 = vpop.f32.mrf.mxu0 }
 0xa01   :  { %v332_v59 = vadd.f32 %v329_v58, %v306_v57 }
 0xa03   :  { %v626_v60 = vmul.f32 -1.442695, %v332_v59 }
 0xa05   :  { %670 = vpow2.f32 %v626_v60 }
 0xa0b   :  { %v671_v61 = vpop.eup %670 }
 0xa0c   :  { %v336_v62 = vadd.f32 1.0, %v671_v61 }
 0xa0e   :  { %672 = vrcp.f32 %v336_v62  ;;  %v348_v2 = vand.u32 2147483648, %v336_v62  ;;  %v346_v4 = vand.u32 2147483647, %v336_v62  ;;  %vm342_vm2 = vweird.f32 %v336_v62 }
 0xa10   :  { %v349_v6 = vor.u32 1.1754944e-38, %v348_v2  ;;  %vm347_vm5 = vcmp.eq.f32.partialorder %v346_v4, 8.507059e+37 }
 0xa14   :  { %v673_v63 = vpop.eup %672 }
 0xa15   :  { %v338_v0 = vmul.f32 %v673_v63, %v336_v62  ;;  %vm343_vm1 = vweird.f32 %v673_v63 }
 0xa16   :  { %vm344_vm3 = vmor %vm342_vm2, %vm343_vm1  ;;  %vm596_vm2 = vcmask 0  }
 0xa17   :  { %v339_v1 = vsub.f32 1.0, %v338_v0 }
 0xa19   :  { %v340_v3 = vmul.f32 %v673_v63, %v339_v1 }
 0xa1b   :  { %v341_v5 = vadd.f32 %v673_v63, %v340_v3 }
 0xa1d   :  { %v345_v7 = vsel %vm344_vm3, %v673_v63, %v341_v5 }
 0xa1e   :  { %v350_v8 = vsel %vm347_vm5, %v349_v6, %v345_v7 }
 0xa1f   :  { %v352_v9 = vmul.f32 2.0, %v350_v8  ;;  %v354_v13 = vmul.f32 %v350_v8, %v299_v52 }
 0xa21   :  { %v627_v10 = vadd.f32 -1.0, %v352_v9 }
 0xa23   :  { %356 = vrot.lane.b32.xlu2 %v627_v10, %s722_s1  ;;  %v501_v10 = vld [vmem:[#allocation2 + $0x7] sm:$0x1] }
 0xa7d   :  { %v357_v11 = vpop.permute.xlu2 %356 }
 0xa7e   :  { %v359_v12 = vmul.f32 %v357_v11, %v350_v8 }
 0xa80   :  { %361 = vrot.lane.b32.xlu0 %v359_v12, %s723_s3 }
 0xaf2   :  { %v362_v14 = vpop.permute.xlu0 %361 }
 0xaf3   :  { %v364_v15 = vadd.f32 %v362_v14, %v354_v13 }
 0xaf5   :  { %674 = vtanh.f32 %v364_v15 }
 0xafb   :  { %v675_v16 = vpop.eup %674 }
 0xafc   :  { %367 = vrot.lane.b32.xlu1 %v675_v16, %s722_s1 }
 0xb6e   :  { %v368_v17 = vpop.permute.xlu1 %367 }
 0xb6f   :  { %v370_v18 = vmul.f32 %v368_v17, %v350_v8 }
 0xb71   :  { %373 = vrot.lane.b32.xlu2 %v370_v18, %s723_s3 }
 0xbcb   :  { %v374_v19 = vpop.permute.xlu2 %373 }
 0xbcc   :  { %628 = vmatmul.msk.f32.vlgmr.msrb.gmra.mxu1 %vm48_vm4, %v374_v19 }
 0xc49   :  { %v394_v21 = vpop.f32.mrf.mxu1 }
 0xc4a   :  { %v397_v22 = vadd.f32 %v394_v21, %v371_v20 }
 0xc4c   :  { %v629_v23 = vmul.f32 -1.442695, %v397_v22 }
 0xc4e   :  { %676 = vpow2.f32 %v629_v23 }
 0xc54   :  { %v677_v24 = vpop.eup %676 }
 0xc55   :  { %v401_v25 = vadd.f32 1.0, %v677_v24 }
 0xc57   :  { %678 = vrcp.f32 %v401_v25  ;;  %v413_v29 = vand.u32 2147483648, %v401_v25  ;;  %v411_v31 = vand.u32 2147483647, %v401_v25  ;;  %vm407_vm7 = vweird.f32 %v401_v25 }
 0xc59   :  { %v414_v33 = vor.u32 1.1754944e-38, %v413_v29  ;;  %vm412_vm9 = vcmp.eq.f32.partialorder %v411_v31, 8.507059e+37 }
 0xc5d   :  { %v679_v26 = vpop.eup %678 }
 0xc5e   :  { %v403_v27 = vmul.f32 %v679_v26, %v401_v25  ;;  %vm408_vm6 = vweird.f32 %v679_v26 }
 0xc5f   :  { %vm409_vm8 = vmor %vm407_vm7, %vm408_vm6 }
 0xc60   :  { %v404_v28 = vsub.f32 1.0, %v403_v27 }
 0xc62   :  { %v405_v30 = vmul.f32 %v679_v26, %v404_v28 }
 0xc64   :  { %v406_v32 = vadd.f32 %v679_v26, %v405_v30 }
 0xc66   :  { %v410_v34 = vsel %vm409_vm8, %v679_v26, %v406_v32 }
 0xc67   :  { %v415_v35 = vsel %vm412_vm9, %v414_v33, %v410_v34  ;;  %v569_v34 = vld [vmem:[%s843_s4 + $0x18] sm:$0xff] }
 0xc68   :  { %v417_v36 = vmul.f32 2.0, %v415_v35  ;;  %v419_v40 = vmul.f32 %v415_v35, %v364_v15  ;;  %588 = vmatpush.msra.mxu0 %v569_v34 }
 0xc6a   :  { %v630_v37 = vadd.f32 -1.0, %v417_v36  ;;  %v567_v36 = vld [vmem:[%s843_s4 + $0x8] sm:$0xff] }
 0xc6c   :  { %421 = vrot.lane.b32.xlu0 %v630_v37, %s722_s1  ;;  %v566_v37 = vld [vmem:[%s843_s4] sm:$0xff] }
 0xcde   :  { %v422_v38 = vpop.permute.xlu0 %421 }
 0xcdf   :  { %v424_v39 = vmul.f32 %v422_v38, %v415_v35 }
 0xce1   :  { %426 = vrot.lane.b32.xlu1 %v424_v39, %s723_s3 }
 0xd53   :  { %v427_v41 = vpop.permute.xlu1 %426 }
 0xd54   :  { %v429_v42 = vadd.f32 %v427_v41, %v419_v40  ;;  %v570_v41 = vld [vmem:[#allocation3] sm:$0x1] }
 0xd56   :  { %680 = vtanh.f32 %v429_v42 }
 0xd5c   :  { %v681_v43 = vpop.eup %680 }
 0xd5d   :  { %432 = vrot.lane.b32.xlu2 %v681_v43, %s722_s1 }
 0xdb7   :  { %v433_v44 = vpop.permute.xlu2 %432 }
 0xdb8   :  { %v435_v45 = vmul.f32 %v433_v44, %v415_v35  ;;  %v568_v35 = vld [vmem:[%s843_s4 + $0x10] sm:$0xff] }
 0xdb9   :  { %589 = vmatpush.msra.mxu0 %v568_v35 }
 0xdba   :  { %438 = vrot.lane.b32.xlu0 %v435_v45, %s723_s3 }
 0xdbb   :  { %590 = vmatpush.msra.mxu0 %v567_v36 }
 0xdbd   :  { %591 = vmatpush.msra.mxu0 %v566_v37 }
 0xe2c   :  { %v439_v46 = vpop.permute.xlu0 %438 }
 0xe2d   :  { %631 = vmatmul.msk.f32.vlgmr.msrb.gmra.mxu2 %vm48_vm4, %v439_v46 }
 0xeb0   :  { %v459_v48 = vpop.f32.mrf.mxu2 }
 0xeb1   :  { %v462_v49 = vadd.f32 %v459_v48, %v436_v47 }
 0xeb3   :  { %v632_v50 = vmul.f32 -1.442695, %v462_v49 }
 0xeb5   :  { %682 = vpow2.f32 %v632_v50 }
 0xebb   :  { %v683_v51 = vpop.eup %682 }
 0xebc   :  { %v466_v52 = vadd.f32 1.0, %v683_v51 }
 0xebe   :  { %684 = vrcp.f32 %v466_v52  ;;  %v478_v56 = vand.u32 2147483648, %v466_v52  ;;  %v476_v58 = vand.u32 2147483647, %v466_v52  ;;  %vm472_vm11 = vweird.f32 %v466_v52 }
 0xec0   :  { %v479_v60 = vor.u32 1.1754944e-38, %v478_v56  ;;  %vm477_vm13 = vcmp.eq.f32.partialorder %v476_v58, 8.507059e+37 }
 0xec4   :  { %v685_v53 = vpop.eup %684 }
 0xec5   :  { %v468_v54 = vmul.f32 %v685_v53, %v466_v52  ;;  %vm473_vm10 = vweird.f32 %v685_v53 }
 0xec6   :  { %vm474_vm12 = vmor %vm472_vm11, %vm473_vm10 }
 0xec7   :  { %v469_v55 = vsub.f32 1.0, %v468_v54 }
 0xec9   :  { %v470_v57 = vmul.f32 %v685_v53, %v469_v55 }
 0xecb   :  { %v471_v59 = vadd.f32 %v685_v53, %v470_v57 }
 0xecd   :  { %v475_v61 = vsel %vm474_vm12, %v685_v53, %v471_v59 }
 0xece   :  { %v480_v62 = vsel %vm477_vm13, %v479_v60, %v475_v61 }
 0xecf   :  { %v482_v63 = vmul.f32 2.0, %v480_v62  ;;  %v484_v3 = vmul.f32 %v480_v62, %v429_v42 }
 0xed1   :  { %v633_v0 = vadd.f32 -1.0, %v482_v63 }
 0xed3   :  { %486 = vrot.lane.b32.xlu1 %v633_v0, %s722_s1 }
 0xf45   :  { %v487_v1 = vpop.permute.xlu1 %486 }
 0xf46   :  { %v489_v2 = vmul.f32 %v487_v1, %v480_v62 }
 0xf48   :  { %491 = vrot.lane.b32.xlu2 %v489_v2, %s723_s3 }
 0xfa2   :  { %v492_v4 = vpop.permute.xlu2 %491 }
 0xfa3   :  { %v494_v5 = vadd.f32 %v492_v4, %v484_v3 }
 0xfa5   :  { %686 = vtanh.f32 %v494_v5 }
 0xfab   :  { %v687_v6 = vpop.eup %686 }
 0xfac   :  { %497 = vrot.lane.b32.xlu0 %v687_v6, %s722_s1 }
0x101e   :  { %v498_v7 = vpop.permute.xlu0 %497 }
0x101f   :  { %v500_v8 = vmul.f32 %v498_v7, %v480_v62 }
0x1021   :  { %503 = vrot.lane.b32.xlu1 %v500_v8, %s723_s3 }
0x1093   :  { %v504_v9 = vpop.permute.xlu1 %503 }
0x1094   :  { %634 = vmatmul.msk.f32.vlgmr.msrb.gmra.mxu3 %vm48_vm4, %v504_v9 }
0x1117   :  { %v524_v11 = vpop.f32.mrf.mxu3 }
0x1118   :  { %v527_v12 = vadd.f32 %v524_v11, %v501_v10 }
0x111a   :  { %v635_v13 = vmul.f32 -1.442695, %v527_v12 }
0x111c   :  { %688 = vpow2.f32 %v635_v13 }
0x1122   :  { %v689_v14 = vpop.eup %688 }
0x1123   :  { %v531_v15 = vadd.f32 1.0, %v689_v14 }
0x1125   :  { %690 = vrcp.f32 %v531_v15  ;;  %v543_v19 = vand.u32 2147483648, %v531_v15  ;;  %v541_v21 = vand.u32 2147483647, %v531_v15  ;;  %vm537_vm15 = vweird.f32 %v531_v15 }
0x1127   :  { %v544_v23 = vor.u32 1.1754944e-38, %v543_v19  ;;  %vm542_vm1 = vcmp.eq.f32.partialorder %v541_v21, 8.507059e+37 }
0x112b   :  { %v691_v16 = vpop.eup %690 }
0x112c   :  { %v533_v17 = vmul.f32 %v691_v16, %v531_v15  ;;  %vm538_vm14 = vweird.f32 %v691_v16 }
0x112d   :  { %vm539_vm0 = vmor %vm537_vm15, %vm538_vm14 }
0x112e   :  { %v534_v18 = vsub.f32 1.0, %v533_v17 }
0x1130   :  { %v535_v20 = vmul.f32 %v691_v16, %v534_v18 }
0x1132   :  { %v536_v22 = vadd.f32 %v691_v16, %v535_v20 }
0x1134   :  { %v540_v24 = vsel %vm539_vm0, %v691_v16, %v536_v22 }
0x1135   :  { %v545_v25 = vsel %vm542_vm1, %v544_v23, %v540_v24 }
0x1136   :  { %v547_v26 = vmul.f32 2.0, %v545_v25  ;;  %v549_v30 = vmul.f32 %v545_v25, %v494_v5 }
0x1138   :  { %v636_v27 = vadd.f32 -1.0, %v547_v26 }
0x113a   :  { %551 = vrot.lane.b32.xlu2 %v636_v27, %s722_s1 }
0x1194   :  { %v552_v28 = vpop.permute.xlu2 %551 }
0x1195   :  { %v554_v29 = vmul.f32 %v552_v28, %v545_v25 }
0x1197   :  { %556 = vrot.lane.b32.xlu0 %v554_v29, %s723_s3 }
0x1209   :  { %v557_v31 = vpop.permute.xlu0 %556 }
0x120a   :  { %v559_v32 = vadd.f32 %v557_v31, %v549_v30 }
0x120c   :  { %692 = vtanh.f32 %v559_v32 }
0x1212   :  { %v693_v33 = vpop.eup %692 }
0x1213   :  { %562 = vrot.lane.b32.xlu1 %v693_v33, %s722_s1 }
0x1285   :  { %v563_v38 = vpop.permute.xlu1 %562 }
0x1286   :  { %v565_v39 = vmul.f32 %v563_v38, %v545_v25 }
0x1288   :  { %572 = vrot.lane.b32.xlu2 %v565_v39, %s723_s3 }
0x12e2   :  { %v573_v40 = vpop.permute.xlu2 %572 }
0x12e3   :  { %637 = vmatmul.msk.f32.vlgmr.msra.gmra.mxu0 %vm48_vm4, %v573_v40 }
0x1360   :  { %v593_v42 = vpop.f32.mrf.mxu0 }
0x1361   :  { %v594_v43 = vadd.f32 %v593_v42, %v570_v41 }
0x1363   :  { %597 = vst.msk [vmem:[#allocation4] sm:$0x1] %vm596_vm2, %v594_v43 }
0x1364   :  { %608 = dma.vmem_to_hbm [thread:$0]  %s604_s19, 16, %s606_s22, [#allocation5]  }
0x1365   :  { %718 = dma.done.wait [#allocation5], 16  }
0x1366   :  { %719 = vsyncadd [#allocation5], 4294967280 }
0x1367   :  { %613 = vsyncpa [#allocation5], 1 }

</bundles_post_ra>
